<compile_context>
chip_gen: v5e
topology: v5e:2x2
jax: 0.10.0
libtpu: 0.0.40
codegen_flags: <defaults>
</compile_context>

<pallas_src>
import jax
import jax.numpy as jnp
from jax.experimental import pallas as pl
from jax.experimental.pallas import tpu as pltpu


def _outconv_kernel(x_ref, w_ref, b_ref, o_ref):
    # x_ref: (Cin, S, 128) VMEM     w_ref: (Cout, Cin) SMEM f32
    # b_ref: (Cout,)       SMEM f32 o_ref: (Cout, S, 128) VMEM
    cin = x_ref.shape[0]
    cout = o_ref.shape[0]
    for co in range(cout):                  # tiny, fully unrolled (Cout=3)
        acc = x_ref[0] * w_ref[co, 0]       # (S,128) * f32 scalar -> f32 acc
        for c in range(1, cin):             # Cin=4
            acc = acc + x_ref[c] * w_ref[co, c]
        # direct per-channel dense store; no concatenate / relayout
        o_ref[co] = (acc + b_ref[co]).astype(o_ref.dtype)


def _hbm_target_bytes_per_step():
    # Faster HBM (v7x, 3.2 TB/s) drains a tile ~2.4x faster than v6e, so it
    # needs a bigger tile to keep the ~0.35us/step overhead small.
    try:
        info = pltpu.get_tpu_info()
        if info.vmem_capacity_bytes <= 64 * 1024 * 1024:   # v7x
            return 6 * 1024 * 1024
    except Exception:
        pass
    return 4 * 1024 * 1024                                  # v5e / v6e


def _pick_tile(R, cin, cout, dt_size, n_batch):
    """Sublane tile S along the (R, 128) pixel grid (multiple of 8, or full R)."""
    if R <= 8:
        return R                             # full extent is always legal
    bytes_per_row = (cin + cout) * 128 * dt_size
    s = _hbm_target_bytes_per_step() // bytes_per_row
    # Cap double-buffered VMEM footprint at ~20 MiB (safe on v5e/v6e/v7x).
    s = min(s, (20 * 1024 * 1024) // (2 * bytes_per_row))
    s = max(8, min(s, R))
    s = (s // 8) * 8
    # Keep at least 2 grid steps so both v7x TensorCores get work.
    if n_batch * pl.cdiv(R, s) < 2 and R >= 16:
        s = max(8, ((R // 2) // 8) * 8)
    return s


def out_conv(x_nchw, weight, bias):
    """1x1 Conv2d forward, identical semantics to nn.Conv2d(Cin, Cout, 1).

    x_nchw: (N, Cin, H, W)
    weight: (Cout, Cin, 1, 1)  (PyTorch layout)
    bias:   (Cout,)
    returns (N, Cout, H, W)
    """
    N, Cin, H, W = x_nchw.shape
    Cout = weight.shape[0]
    HW = H * W
    dt_size = jnp.dtype(x_nchw.dtype).itemsize

    # Pad the pixel axis to a multiple of 128 lanes (once, in the wrapper).
    R = pl.cdiv(HW, 128)
    HW_pad = R * 128
    x3 = x_nchw.reshape(N, Cin, HW)                   # free contiguous reshape
    if HW_pad != HW:
        x3 = jnp.pad(x3, ((0, 0), (0, 0), (0, HW_pad - HW)))
    x4 = x3.reshape(N, Cin, R, 128)                   # free contiguous reshape

    w_mat = weight.reshape(Cout, Cin).astype(jnp.float32)   # tiny -> SMEM
    b_vec = bias.reshape(Cout).astype(jnp.float32)

    S = _pick_tile(R, Cin, Cout, dt_size, N)
    grid = (N, pl.cdiv(R, S))

    cost = pl.CostEstimate(
        flops=2 * N * HW_pad * Cin * Cout,
        transcendentals=0,
        bytes_accessed=N * HW_pad * (Cin + Cout) * dt_size
        + (Cout * Cin + Cout) * 4,
    )

    y4 = pl.pallas_call(
        _outconv_kernel,
        out_shape=jax.ShapeDtypeStruct((N, Cout, R, 128), x_nchw.dtype),
        grid_spec=pltpu.PrefetchScalarGridSpec(
            num_scalar_prefetch=0,
            grid=grid,
            in_specs=[
                # batch squeezed, all channels, dense (S,128) pixel slab
                pl.BlockSpec((None, Cin, S, 128), lambda n, j: (n, 0, j, 0)),
                # tiny weight / bias live in SMEM, read as scalars
                pl.BlockSpec(memory_space=pltpu.MemorySpace.SMEM),
                pl.BlockSpec(memory_space=pltpu.MemorySpace.SMEM),
            ],
            out_specs=pl.BlockSpec((None, Cout, S, 128), lambda n, j: (n, 0, j, 0)),
        ),
        compiler_params=pltpu.CompilerParams(
            dimension_semantics=("parallel", "parallel"),
            vmem_limit_bytes=48 * 1024 * 1024,
        ),
        cost_estimate=cost,
    )(x4, w_mat, b_vec)

    y3 = y4.reshape(N, Cout, HW_pad)
    if HW_pad != HW:
        y3 = y3[:, :, :HW]
    return y3.reshape(N, Cout, H, W)


def _reference(x_nchw, weight, bias):
    # Pure-JAX reference of nn.Conv2d(kernel_size=1)
    w = weight.reshape(weight.shape[0], weight.shape[1])  # (Cout, Cin)
    return jnp.einsum("nchw,oc->nohw", x_nchw, w) + bias[None, :, None, None]


if __name__ == "__main__":
    # Module config: OutConv(in_channels=4, out_channels=3)
    in_channels, out_channels = 4, 3
    N, H, W = 2, 16, 16

    key = jax.random.PRNGKey(0)
    kx, kw, kb = jax.random.split(key, 3)

    x = jax.random.normal(kx, (N, in_channels, H, W), dtype=jnp.float32)

    # Deterministic parameter init (PyTorch-style uniform bound = 1/sqrt(fan_in))
    fan_in = in_channels * 1 * 1
    bound = 1.0 / (fan_in ** 0.5)
    weight = jax.random.uniform(
        kw, (out_channels, in_channels, 1, 1), minval=-bound, maxval=bound,
        dtype=jnp.float32)
    bias = jax.random.uniform(
        kb, (out_channels,), minval=-bound, maxval=bound, dtype=jnp.float32)

    y = out_conv(x, weight, bias)
    jax.block_until_ready(y)

    y_ref = _reference(x, weight, bias)
    assert y.shape == (N, out_channels, H, W)
    assert jnp.allclose(y, y_ref, atol=1e-5, rtol=1e-5), "mismatch vs reference"

    print("KERNEL_OK")
</pallas_src>

<mosaic_0001>
module attributes {stable_mosaic.version = 11 : i64} {
  func.func @_outconv_kernel(%arg0: i32, %arg1: i32, %arg2: memref<1x4x2x128xf32, #tpu.memory_space<vmem>>, %arg3: memref<3x4xf32, #tpu.memory_space<smem>>, %arg4: memref<3xf32, #tpu.memory_space<smem>>, %arg5: memref<1x3x2x128xf32, #tpu.memory_space<vmem>>) attributes {dimension_semantics = [#tpu.dimension_semantics<parallel>, #tpu.dimension_semantics<parallel>], iteration_bounds = array<i64: 2, 1>, scalar_prefetch = 0 : i64, scratch_operands = 0 : i64, tpu.core_type = #tpu.core_type<tc>, window_params = [{transform_indices = @transform_0, window_bounds = array<i64: 1, 4, 2, 128>}, {transform_indices = @transform_1, window_bounds = array<i64: 3, 4>}, {transform_indices = @transform_2, window_bounds = array<i64: 3>}, {transform_indices = @transform_3, window_bounds = array<i64: 1, 3, 2, 128>}]} {
    %c0 = arith.constant 0 : index
    %c0_0 = arith.constant 0 : index
    %c0_1 = arith.constant 0 : index
    %c0_2 = arith.constant 0 : index
    %0 = vector.load %arg2[%c0, %c0_0, %c0_1, %c0_2] : memref<1x4x2x128xf32, #tpu.memory_space<vmem>>, vector<1x1x2x128xf32>
    %1 = vector.shape_cast %0 : vector<1x1x2x128xf32> to vector<2x128xf32>
    %c0_3 = arith.constant 0 : index
    %c0_4 = arith.constant 0 : index
    %2 = memref.load %arg3[%c0_3, %c0_4] : memref<3x4xf32, #tpu.memory_space<smem>>
    %3 = vector.broadcast %2 : f32 to vector<2x128xf32>
    %4 = arith.mulf %1, %3 : vector<2x128xf32>
    %c0_5 = arith.constant 0 : index
    %c1 = arith.constant 1 : index
    %c0_6 = arith.constant 0 : index
    %c0_7 = arith.constant 0 : index
    %5 = vector.load %arg2[%c0_5, %c1, %c0_6, %c0_7] : memref<1x4x2x128xf32, #tpu.memory_space<vmem>>, vector<1x1x2x128xf32>
    %6 = vector.shape_cast %5 : vector<1x1x2x128xf32> to vector<2x128xf32>
    %c0_8 = arith.constant 0 : index
    %c1_9 = arith.constant 1 : index
    %7 = memref.load %arg3[%c0_8, %c1_9] : memref<3x4xf32, #tpu.memory_space<smem>>
    %8 = vector.broadcast %7 : f32 to vector<2x128xf32>
    %9 = arith.mulf %6, %8 : vector<2x128xf32>
    %10 = arith.addf %4, %9 : vector<2x128xf32>
    %c0_10 = arith.constant 0 : index
    %c2 = arith.constant 2 : index
    %c0_11 = arith.constant 0 : index
    %c0_12 = arith.constant 0 : index
    %11 = vector.load %arg2[%c0_10, %c2, %c0_11, %c0_12] : memref<1x4x2x128xf32, #tpu.memory_space<vmem>>, vector<1x1x2x128xf32>
    %12 = vector.shape_cast %11 : vector<1x1x2x128xf32> to vector<2x128xf32>
    %c0_13 = arith.constant 0 : index
    %c2_14 = arith.constant 2 : index
    %13 = memref.load %arg3[%c0_13, %c2_14] : memref<3x4xf32, #tpu.memory_space<smem>>
    %14 = vector.broadcast %13 : f32 to vector<2x128xf32>
    %15 = arith.mulf %12, %14 : vector<2x128xf32>
    %16 = arith.addf %10, %15 : vector<2x128xf32>
    %c0_15 = arith.constant 0 : index
    %c3 = arith.constant 3 : index
    %c0_16 = arith.constant 0 : index
    %c0_17 = arith.constant 0 : index
    %17 = vector.load %arg2[%c0_15, %c3, %c0_16, %c0_17] : memref<1x4x2x128xf32, #tpu.memory_space<vmem>>, vector<1x1x2x128xf32>
    %18 = vector.shape_cast %17 : vector<1x1x2x128xf32> to vector<2x128xf32>
    %c0_18 = arith.constant 0 : index
    %c3_19 = arith.constant 3 : index
    %19 = memref.load %arg3[%c0_18, %c3_19] : memref<3x4xf32, #tpu.memory_space<smem>>
    %20 = vector.broadcast %19 : f32 to vector<2x128xf32>
    %21 = arith.mulf %18, %20 : vector<2x128xf32>
    %22 = arith.addf %16, %21 : vector<2x128xf32>
    %c0_20 = arith.constant 0 : index
    %23 = memref.load %arg4[%c0_20] : memref<3xf32, #tpu.memory_space<smem>>
    %24 = vector.broadcast %23 : f32 to vector<2x128xf32>
    %25 = arith.addf %22, %24 : vector<2x128xf32>
    %c0_21 = arith.constant 0 : index
    %c0_22 = arith.constant 0 : index
    %c0_23 = arith.constant 0 : index
    %c0_24 = arith.constant 0 : index
    %26 = vector.load %arg5[%c0_21, %c0_22, %c0_23, %c0_24] : memref<1x3x2x128xf32, #tpu.memory_space<vmem>>, vector<1x1x2x128xf32>
    %27 = vector.shape_cast %26 : vector<1x1x2x128xf32> to vector<2x128xf32>
    %28 = vector.shape_cast %25 : vector<2x128xf32> to vector<1x1x2x128xf32>
    tpu.vector_store %arg5[%c0_21, %c0_22, %c0_23, %c0_24], %28 {strides = array<i32>} : memref<1x3x2x128xf32, #tpu.memory_space<vmem>>, vector<1x1x2x128xf32>,
    %c0_25 = arith.constant 0 : index
    %c0_26 = arith.constant 0 : index
    %c0_27 = arith.constant 0 : index
    %c0_28 = arith.constant 0 : index
    %29 = vector.load %arg2[%c0_25, %c0_26, %c0_27, %c0_28] : memref<1x4x2x128xf32, #tpu.memory_space<vmem>>, vector<1x1x2x128xf32>
    %30 = vector.shape_cast %29 : vector<1x1x2x128xf32> to vector<2x128xf32>
    %c1_29 = arith.constant 1 : index
    %c0_30 = arith.constant 0 : index
    %31 = memref.load %arg3[%c1_29, %c0_30] : memref<3x4xf32, #tpu.memory_space<smem>>
    %32 = vector.broadcast %31 : f32 to vector<2x128xf32>
    %33 = arith.mulf %30, %32 : vector<2x128xf32>
    %c0_31 = arith.constant 0 : index
    %c1_32 = arith.constant 1 : index
    %c0_33 = arith.constant 0 : index
    %c0_34 = arith.constant 0 : index
    %34 = vector.load %arg2[%c0_31, %c1_32, %c0_33, %c0_34] : memref<1x4x2x128xf32, #tpu.memory_space<vmem>>, vector<1x1x2x128xf32>
    %35 = vector.shape_cast %34 : vector<1x1x2x128xf32> to vector<2x128xf32>
    %c1_35 = arith.constant 1 : index
    %c1_36 = arith.constant 1 : index
    %36 = memref.load %arg3[%c1_35, %c1_36] : memref<3x4xf32, #tpu.memory_space<smem>>
    %37 = vector.broadcast %36 : f32 to vector<2x128xf32>
    %38 = arith.mulf %35, %37 : vector<2x128xf32>
    %39 = arith.addf %33, %38 : vector<2x128xf32>
    %c0_37 = arith.constant 0 : index
    %c2_38 = arith.constant 2 : index
    %c0_39 = arith.constant 0 : index
    %c0_40 = arith.constant 0 : index
    %40 = vector.load %arg2[%c0_37, %c2_38, %c0_39, %c0_40] : memref<1x4x2x128xf32, #tpu.memory_space<vmem>>, vector<1x1x2x128xf32>
    %41 = vector.shape_cast %40 : vector<1x1x2x128xf32> to vector<2x128xf32>
    %c1_41 = arith.constant 1 : index
    %c2_42 = arith.constant 2 : index
    %42 = memref.load %arg3[%c1_41, %c2_42] : memref<3x4xf32, #tpu.memory_space<smem>>
    %43 = vector.broadcast %42 : f32 to vector<2x128xf32>
    %44 = arith.mulf %41, %43 : vector<2x128xf32>
    %45 = arith.addf %39, %44 : vector<2x128xf32>
    %c0_43 = arith.constant 0 : index
    %c3_44 = arith.constant 3 : index
    %c0_45 = arith.constant 0 : index
    %c0_46 = arith.constant 0 : index
    %46 = vector.load %arg2[%c0_43, %c3_44, %c0_45, %c0_46] : memref<1x4x2x128xf32, #tpu.memory_space<vmem>>, vector<1x1x2x128xf32>
    %47 = vector.shape_cast %46 : vector<1x1x2x128xf32> to vector<2x128xf32>
    %c1_47 = arith.constant 1 : index
    %c3_48 = arith.constant 3 : index
    %48 = memref.load %arg3[%c1_47, %c3_48] : memref<3x4xf32, #tpu.memory_space<smem>>
    %49 = vector.broadcast %48 : f32 to vector<2x128xf32>
    %50 = arith.mulf %47, %49 : vector<2x128xf32>
    %51 = arith.addf %45, %50 : vector<2x128xf32>
    %c1_49 = arith.constant 1 : index
    %52 = memref.load %arg4[%c1_49] : memref<3xf32, #tpu.memory_space<smem>>
    %53 = vector.broadcast %52 : f32 to vector<2x128xf32>
    %54 = arith.addf %51, %53 : vector<2x128xf32>
    %c0_50 = arith.constant 0 : index
    %c1_51 = arith.constant 1 : index
    %c0_52 = arith.constant 0 : index
    %c0_53 = arith.constant 0 : index
    %55 = vector.load %arg5[%c0_50, %c1_51, %c0_52, %c0_53] : memref<1x3x2x128xf32, #tpu.memory_space<vmem>>, vector<1x1x2x128xf32>
    %56 = vector.shape_cast %55 : vector<1x1x2x128xf32> to vector<2x128xf32>
    %57 = vector.shape_cast %54 : vector<2x128xf32> to vector<1x1x2x128xf32>
    tpu.vector_store %arg5[%c0_50, %c1_51, %c0_52, %c0_53], %57 {strides = array<i32>} : memref<1x3x2x128xf32, #tpu.memory_space<vmem>>, vector<1x1x2x128xf32>,
    %c0_54 = arith.constant 0 : index
    %c0_55 = arith.constant 0 : index
    %c0_56 = arith.constant 0 : index
    %c0_57 = arith.constant 0 : index
    %58 = vector.load %arg2[%c0_54, %c0_55, %c0_56, %c0_57] : memref<1x4x2x128xf32, #tpu.memory_space<vmem>>, vector<1x1x2x128xf32>
    %59 = vector.shape_cast %58 : vector<1x1x2x128xf32> to vector<2x128xf32>
    %c2_58 = arith.constant 2 : index
    %c0_59 = arith.constant 0 : index
    %60 = memref.load %arg3[%c2_58, %c0_59] : memref<3x4xf32, #tpu.memory_space<smem>>
    %61 = vector.broadcast %60 : f32 to vector<2x128xf32>
    %62 = arith.mulf %59, %61 : vector<2x128xf32>
    %c0_60 = arith.constant 0 : index
    %c1_61 = arith.constant 1 : index
    %c0_62 = arith.constant 0 : index
    %c0_63 = arith.constant 0 : index
    %63 = vector.load %arg2[%c0_60, %c1_61, %c0_62, %c0_63] : memref<1x4x2x128xf32, #tpu.memory_space<vmem>>, vector<1x1x2x128xf32>
    %64 = vector.shape_cast %63 : vector<1x1x2x128xf32> to vector<2x128xf32>
    %c2_64 = arith.constant 2 : index
    %c1_65 = arith.constant 1 : index
    %65 = memref.load %arg3[%c2_64, %c1_65] : memref<3x4xf32, #tpu.memory_space<smem>>
    %66 = vector.broadcast %65 : f32 to vector<2x128xf32>
    %67 = arith.mulf %64, %66 : vector<2x128xf32>
    %68 = arith.addf %62, %67 : vector<2x128xf32>
    %c0_66 = arith.constant 0 : index
    %c2_67 = arith.constant 2 : index
    %c0_68 = arith.constant 0 : index
    %c0_69 = arith.constant 0 : index
    %69 = vector.load %arg2[%c0_66, %c2_67, %c0_68, %c0_69] : memref<1x4x2x128xf32, #tpu.memory_space<vmem>>, vector<1x1x2x128xf32>
    %70 = vector.shape_cast %69 : vector<1x1x2x128xf32> to vector<2x128xf32>
    %c2_70 = arith.constant 2 : index
    %c2_71 = arith.constant 2 : index
    %71 = memref.load %arg3[%c2_70, %c2_71] : memref<3x4xf32, #tpu.memory_space<smem>>
    %72 = vector.broadcast %71 : f32 to vector<2x128xf32>
    %73 = arith.mulf %70, %72 : vector<2x128xf32>
    %74 = arith.addf %68, %73 : vector<2x128xf32>
    %c0_72 = arith.constant 0 : index
    %c3_73 = arith.constant 3 : index
    %c0_74 = arith.constant 0 : index
    %c0_75 = arith.constant 0 : index
    %75 = vector.load %arg2[%c0_72, %c3_73, %c0_74, %c0_75] : memref<1x4x2x128xf32, #tpu.memory_space<vmem>>, vector<1x1x2x128xf32>
    %76 = vector.shape_cast %75 : vector<1x1x2x128xf32> to vector<2x128xf32>
    %c2_76 = arith.constant 2 : index
    %c3_77 = arith.constant 3 : index
    %77 = memref.load %arg3[%c2_76, %c3_77] : memref<3x4xf32, #tpu.memory_space<smem>>
    %78 = vector.broadcast %77 : f32 to vector<2x128xf32>
    %79 = arith.mulf %76, %78 : vector<2x128xf32>
    %80 = arith.addf %74, %79 : vector<2x128xf32>
    %c2_78 = arith.constant 2 : index
    %81 = memref.load %arg4[%c2_78] : memref<3xf32, #tpu.memory_space<smem>>
    %82 = vector.broadcast %81 : f32 to vector<2x128xf32>
    %83 = arith.addf %80, %82 : vector<2x128xf32>
    %c0_79 = arith.constant 0 : index
    %c2_80 = arith.constant 2 : index
    %c0_81 = arith.constant 0 : index
    %c0_82 = arith.constant 0 : index
    %84 = vector.load %arg5[%c0_79, %c2_80, %c0_81, %c0_82] : memref<1x3x2x128xf32, #tpu.memory_space<vmem>>, vector<1x1x2x128xf32>
    %85 = vector.shape_cast %84 : vector<1x1x2x128xf32> to vector<2x128xf32>
    %86 = vector.shape_cast %83 : vector<2x128xf32> to vector<1x1x2x128xf32>
    tpu.vector_store %arg5[%c0_79, %c2_80, %c0_81, %c0_82], %86 {strides = array<i32>} : memref<1x3x2x128xf32, #tpu.memory_space<vmem>>, vector<1x1x2x128xf32>,
    return
  }
  func.func @transform_0(%arg0: i32, %arg1: i32) -> (i32, i32, i32, i32) {
    %c0_i32 = arith.constant 0 : i32
    %c0_i32_0 = arith.constant 0 : i32
    %c0_i32_1 = arith.constant 0 : i32
    return %arg0, %c0_i32, %arg1, %c0_i32_0 : i32, i32, i32, i32
  }
  func.func @transform_1(%arg0: i32, %arg1: i32) -> (i32, i32) {
    %c0_i32 = arith.constant 0 : i32
    %c0_i32_0 = arith.constant 0 : i32
    %c0_i32_1 = arith.constant 0 : i32
    return %c0_i32, %c0_i32_0 : i32, i32
  }
  func.func @transform_2(%arg0: i32, %arg1: i32) -> i32 {
    %c0_i32 = arith.constant 0 : i32
    %c0_i32_0 = arith.constant 0 : i32
    return %c0_i32 : i32
  }
  func.func @transform_3(%arg0: i32, %arg1: i32) -> (i32, i32, i32, i32) {
    %c0_i32 = arith.constant 0 : i32
    %c0_i32_0 = arith.constant 0 : i32
    %c0_i32_1 = arith.constant 0 : i32
    return %arg0, %c0_i32, %arg1, %c0_i32_0 : i32, i32, i32, i32
  }
}

</mosaic_0001>

<bundles_post_ra>
// kernel: tpu_custom_call.1
= control target key start
LH: loop header
LB: loop body
LE: loop exit
PB: predicated region body
PF: predicated region fallthrough
CT: control target
= control target key end

     0   :  { %s922_s0 = inlined_call_operand.hbm [shape: f32[2,4,2,128], index: 0, kind: input, shape index: {}]   ;;  %s923_s1 = inlined_call_operand.hbm [shape: f32[3,4], index: 1, kind: input, shape index: {}]   ;;  %s924_s2 = inlined_call_operand.vmem [shape: f32[3], index: 2, kind: input, shape index: {}]   ;;  %s925_s3 = inlined_call_operand.hbm [shape: f32[2,3,2,128], index: 3, kind: output, shape index: {}]  }
   0x1   :  { %926 = sst [smem:[#allocation14_spill]] %s923_s1 }
   0x2   :  { %8 = vsyncpa [#allocation3], 0 }
   0x3   :  { %10 = vsyncpa [#allocation3 + $0x1], 0 }
   0x4   :  { %11 = vsyncpa [#allocation5], 0 }
   0x5   :  { %12 = vsyncpa [#allocation6], 0 }
   0x6   :  { %13 = vsyncpa [#allocation4], 0 }
   0x7   :  { %15 = vsyncpa [#allocation4 + $0x1], 0  ;;  %s743_s12 = smov 0   ;;  %s745_s13 = smov 0  }
   0x8   :  { %s747_s14 = smov 0   ;;  %s749_s15 = smov 0  }
   0x9   :  { %s751_s16 = smov 0   ;;  %s753_s17 = smov 0  }
   0xa LB: > { %s435_s18 = sadd.s32 4294967295, %s715_s17   ;;  %s436_s19 = sadd.s32 4294967294, %s715_s17   ;;  %s715_s17 = sphi %s753_s17, %s21_s17   ;;  %s711_s16 = sphi %s751_s16, %s939_s16   ;;  %s707_s15 = sphi %s749_s15, %s938_s15   ;;  %s703_s14 = sphi %s747_s14, %s937_s14   ;;  %s699_s13 = sphi %s745_s13, %s936_s13   ;;  %s695_s12 = sphi %s743_s12, %s935_s12  }
   0xb   : > { %s42_s20 = sadd.s32 1, %s703_s14  ;;  %p49_p0 = scmp.ne.s32.totalorder %s703_s14, %s699_s13 }
   0xc   : > { %p50_p1 = scmp.eq.s32.totalorder %s715_s17, 0  ;;  %p55_p2 = scmp.ne.s32.totalorder %s699_s13, %s695_s12 }
   0xd   : > { %p781_p3 = scmp.eq.s32.totalorder %s435_s18, 0  ;;  %p123_p4 = scmp.eq.s32.totalorder %s435_s18, 1 }
   0xe   : > { %p785_p5 = por %p50_p1, %p49_p0  ;;  %p129_p6 = scmp.eq.s32.totalorder %s436_s19, 1 }
   0xf   : > { %p791_p7 = por %p781_p3, %p55_p2  ;;  %p795_p8 = por %p123_p4, %p49_p0 }
  0x10   : > { %p799_p9 = por %p129_p6, %p55_p2  ;;  %p437_p10 = scmp.ge.s32.totalorder %s715_s17, 1 }
  0x11   : > { %p136_p11 = scmp.lt.s32.totalorder %s715_s17, 3  ;;  %s932_s1 = sld [smem:[#allocation14_spill]] }
  0x12   : > { %p440_p13 = scmp.ge.s32.totalorder %s715_s17, 2  ;;  %p507_p0 = scmp.lt.s32.totalorder %s715_s17, 2 }
  0x13   : > { %p808_p12 = pnand %p437_p10, %p136_p11  ;;  %s158_s5 = sshll.u32 %s924_s2, 4  ;;  %s159_s5 = int_to_ptr.vmem [resolvable:$true] %s158_s5 }
  0x14   : > { %p821_p2 = pnand %p507_p0, %p785_p5  ;;  %s717_s7 = smov [#allocation7]  }
  0x15   : > { %p490_p1 = pneg %p808_p12  ;;  %s718_s8 = smov [#allocation8]  }
  0x16   : > { %s33_s9 = sadd.s32 1, %s711_s16  ;;  %s169_s10 = sand.u32 1, %s703_s14  }
  0x17   : > { %s148_s28 = sshll.u32 %s932_s1, 4  ;;  %p491_p4 = pnand %p490_p1, %p781_p3  ;;  %s149_s28 = int_to_ptr.hbm [resolvable:$true] %s148_s28 }
  0x18   : > { %p35_p6 = scmp.ge.s32.totalorder %s33_s9, 2  ;;  %s441_s11 = sshll.u32 %s169_s10, 3 }
  0x19   : > { %493 = dma.hbm_to_smem (!%p491_p4), %s149_s28, 64, %s717_s7, [#allocation5]  }
  0x1a   : > { %496 = dma.vmem_to_smem (!%p491_p4), %s159_s5, 16, %s718_s8, [#allocation6]  }
  0x1b   : > { %s475_s18 = sshll.u32 %s711_s16, 3  ;;  %s941_s9 = smov (%p35_p6, %s33_s9), 0 }
  0x1c   : > { %s179_s26 = scalar_lea.hbm %s922_s0, %s475_s18  ;;  %s37_s27 = ssub.s32 %s711_s16, %s941_s9 }
  0x1d   : > { %s180_s30 = sshll.u32 %s179_s26, 4  ;;  %p40_p5 = scmp.eq.s32.totalorder %s37_s27, 0  ;;  %s181_s30 = int_to_ptr.hbm [resolvable:$true] %s180_s30 }
  0x1e   : > { %s173_s28 = scalar_lea.vmem [#allocation2], %s441_s11  ;;  %s170_s7 = scalar_lea.sflag [#allocation3], %s169_s10 }
  0x1f   : > { %s182_s4 = sshll.u32 %s173_s28, 4  ;;  %s719_s8 = smov 32   ;;  %s183_s4 = int_to_ptr.vmem [resolvable:$true] %s182_s4 }
  0x20   : > { %s840_s5 = scalar_select %p40_p5, %s703_s14, %s42_s20  }
  0x21   : > { %s720_s1 = smov 2   ;;  %194 = sbr.rel (%p808_p12) target bundleno = 77 (0x4d), region = 32 }
  0x22   : > { %500 = dma.hbm_to_vmem [thread:$0]  (!%p821_p2), %s181_s30, 128, %s183_s4, %s170_s7, %s719_s8, %s719_s8, %s720_s1  }
  0x23   : > { %s847_s18 = sand.u32 (!%p808_p12), 1, %s699_s13  }
  0x24   : > { %s445_s11 = sshll.u32 (!%p808_p12), %s847_s18, 3  ;;  %s197_s19 = scalar_lea.sflag (!%p808_p12), [#allocation3], %s847_s18 }
  0x25   : > { %s851_s22 = scalar_lea.vmem (!%p808_p12), [#allocation2], %s445_s11 }
  0x26   : > { %678 = dma.done.wait (%p791_p7), %s197_s19, 128  }
  0x27   : > { %680 = vsyncadd (%p791_p7), %s197_s19, 4294967168 }
  0x28   : > { %682 = dma.done.wait (%p781_p3), [#allocation5], 64  }
  0x29   : > { %684 = vsyncadd (%p781_p3), [#allocation5], 4294967232 }
  0x2a   : > { %686 = dma.done.wait (%p781_p3), [#allocation6], 16  }
  0x2b   : > { %688 = vsyncadd (%p781_p3), [#allocation6], 4294967280 }
  0x2c   : > { %216 = sfence }
  0x2d   : > { %s236_s1 = sld [smem:[#allocation7]]  ;;  %v235_v0 = vld [vmem:[%s851_s22] sm:$0x3]  ;;  %v448_v1 = vld [vmem:[%s851_s22 + $0x2] sm:$0x3]  ;;  %s476_s4 = smul.u32 6, %s847_s18 }
  0x2e   : > { %s449_s20 = sld [smem:[#allocation7 + $0x1]]  ;;  %v450_v3 = vld [vmem:[%s851_s22 + $0x4] sm:$0x3]  ;;  %v452_v6 = vld [vmem:[%s851_s22 + $0x6] sm:$0x3] }
  0x2f   : > { %s451_s23 = sld [smem:[#allocation7 + $0x2]]  ;;  %v261_v11 = vld [vmem:[%s851_s22] sm:$0x3]  ;;  %v455_v14 = vld [vmem:[%s851_s22 + $0x2] sm:$0x3] }
  0x30   : > { %s453_s29 = sld [smem:[#allocation7 + $0x3]]  ;;  %v457_v16 = vld [vmem:[%s851_s22 + $0x4] sm:$0x3]  ;;  %v459_v20 = vld [vmem:[%s851_s22 + $0x6] sm:$0x3] }
  0x31   : > { %s866_s6 = sld [smem:[#allocation8]]  ;;  %v285_v27 = vld [vmem:[%s851_s22] sm:$0x3]  ;;  %v464_v30 = vld [vmem:[%s851_s22 + $0x2] sm:$0x3] }
  0x32   : > { %s454_s10 = sld [smem:[#allocation7 + $0x80]]  ;;  %v466_v33 = vld [vmem:[%s851_s22 + $0x4] sm:$0x3]  ;;  %v468_v37 = vld [vmem:[%s851_s22 + $0x6] sm:$0x3] }
  0x33   : > { %v237_v2 = vstv %s236_s1  ;;  %s456_s21 = sld [smem:[#allocation7 + $0x81]]  ;;  %s477_s1 = smul.u32 6, %s707_s15 }
  0x34   : > { %v238_v4 = vmul.f32 %v237_v2, %v235_v0  ;;  %v242_v5 = vstv %s449_s20  ;;  %s458_s26 = sld [smem:[#allocation7 + $0x82]]  ;;  %s234_s20 = scalar_lea.vmem [#allocation9], %s476_s4 }
  0x35   : > { %v243_v7 = vmul.f32 %v448_v1, %v242_v5  ;;  %v248_v8 = vstv %s451_s23  ;;  %s460_s27 = sld [smem:[#allocation7 + $0x83]]  ;;  %s323_s15 = sshll.u32 %s234_s20, 4  ;;  %s324_s15 = int_to_ptr.vmem [resolvable:$true] %s323_s15 }
  0x36   : > { %v249_v9 = vmul.f32 %v450_v3, %v248_v8  ;;  %v254_v10 = vstv %s453_s29  ;;  %s872_s30 = sld [smem:[#allocation8 + $0x1]] }
  0x37   : > { %v244_v12 = vadd.f32 %v243_v7, %v238_v4  ;;  %v255_v13 = vmul.f32 %v452_v6, %v254_v10  ;;  %s463_s28 = sld [smem:[#allocation7 + $0x100]]  ;;  %v258_v21 = vstv %s866_s6  ;;  %s322_s6 = scalar_lea.hbm %s925_s3, %s477_s1 }
  0x38   : > { %v263_v15 = vstv %s454_s10  ;;  %s465_s7 = sld [smem:[#allocation7 + $0x101]]  ;;  %s325_s22 = sshll.u32 %s322_s6, 4  ;;  %s326_s22 = int_to_ptr.hbm [resolvable:$true] %s325_s22 }
  0x39   : > { %v250_v17 = vadd.f32 %v249_v9, %v244_v12  ;;  %v264_v18 = vmul.f32 %v263_v15, %v261_v11  ;;  %v267_v19 = vstv %s456_s21  ;;  %s467_s8 = sld [smem:[#allocation7 + $0x102]]  ;;  %s310_s10 = scalar_lea.sflag [#allocation4], %s847_s18 }
  0x3a   : > { %v268_v22 = vmul.f32 %v455_v14, %v267_v19  ;;  %v272_v23 = vstv %s458_s26  ;;  %s469_s11 = sld [smem:[#allocation7 + $0x103]]  ;;  %s639_s21 = sshra.s32 %s326_s22, 4  ;;  %s640_s21 = int_to_ptr.hbm [resolvable:$true] %s639_s21 }
  0x3b   : > { %v256_v24 = vadd.f32 %v255_v13, %v250_v17  ;;  %v273_v25 = vmul.f32 %v457_v16, %v272_v23  ;;  %v277_v26 = vstv %s460_s27  ;;  %s470_s19 = sld [smem:[#allocation8 + $0x2]]  ;;  %s641_s26 = scalar_lea.hbm %s640_s21, 6 }
  0x3c   : > { %v269_v28 = vadd.f32 %v268_v22, %v264_v18  ;;  %v278_v29 = vmul.f32 %v459_v20, %v277_v26  ;;  %v281_v38 = vstv %s872_s30  ;;  %p642_p3 = scmp.ne.s32.totalorder %s640_s21, %s641_s26  ;;  %p646_p11 = scmp.lt.s32.totalorder %s640_s21, %s925_s3 }
  0x3d   : > { %v259_v31 = vadd.f32 %v258_v21, %v256_v24  ;;  %v287_v32 = vstv %s463_s28  ;;  %s645_s28 = scalar_lea.hbm %s925_s3, 12 }
  0x3e   : > { %v274_v34 = vadd.f32 %v273_v25, %v269_v28  ;;  %v288_v35 = vmul.f32 %v287_v32, %v285_v27  ;;  %v291_v36 = vstv %s465_s7  ;;  %p643_p7 = pnand %p642_p3, %p795_p8  ;;  %p647_p12 = scmp.lt.s32.totalorder %s645_s28, %s641_s26 }
  0x3f   : > { %260 = vst [vmem:[%s234_s20] sm:$0x3] %v259_v31  ;;  %v292_v39 = vmul.f32 %v464_v30, %v291_v36  ;;  %v296_v40 = vstv %s467_s8 }
  0x40   : > { %v279_v41 = vadd.f32 %v278_v29, %v274_v34  ;;  %v297_v42 = vmul.f32 %v466_v33, %v296_v40  ;;  %v301_v43 = vstv %s469_s11  ;;  %p644_p10 = pneg %p643_p7  ;;  %p648_p0 = por %p647_p12, %p646_p11 }
  0x41   : > { %v293_v44 = vadd.f32 %v292_v39, %v288_v35  ;;  %v302_v45 = vmul.f32 %v468_v37, %v301_v43  ;;  %v305_v48 = vstv %s470_s19 }
  0x42   : > { %v282_v46 = vadd.f32 %v281_v38, %v279_v41  ;;  %p649_p1 = pnand %p648_p0, %p644_p10 }
  0x43   : > { %v298_v47 = vadd.f32 %v297_v42, %v293_v44 }
  0x44   : > { %462 = vst [vmem:[%s234_s20 + $0x2] sm:$0x3] %v282_v46 }
  0x45   : > { %v303_v49 = vadd.f32 %v302_v45, %v298_v47 }
  0x47   : > { %v306_v50 = vadd.f32 %v305_v48, %v303_v49 }
  0x49   : > { %471 = vst [vmem:[%s234_s20 + $0x4] sm:$0x3] %v306_v50 }
  0x4a   : > { %652 = shalt.err (!%p649_p1)
}
  0x4b   : > { %s721_s18 = smov 32   ;;  %s722_s8 = smov 2  }
  0x4c   : > { %488 = dma.vmem_to_hbm [thread:$0]  (%p795_p8), %s324_s15, 96, %s326_s22, %s310_s10, %s721_s18, %s721_s18, %s722_s8  }
  0x4d PF: > { %s340_s11 = sand.u32 1, %s695_s12   ;;  %p502_p2 = pnand %p440_p13, %p799_p9 }
  0x4e   : > { %s341_s19 = scalar_lea.sflag [#allocation4], %s340_s11 }
  0x4f   : > { %p503_p4 = pneg %p502_p2 }
  0x51   : > { %690 = dma.done.wait (%p503_p4), %s341_s19, 96  }
  0x52   : > { %692 = vsyncadd (%p503_p4), %s341_s19, 4294967200  ;;  %s21_s17 = sadd.s32 1, %s715_s17   ;;  %s935_s12 = smov %s699_s13 }
  0x53   : > { %p18_p6 = scmp.ge.s32.totalorder %s21_s17, 4   ;;  %s936_s13 = smov %s703_s14 }
  0x54   : > { %s937_s14 = smov %s840_s5  ;;  %s938_s15 = smov %s711_s16 }
  0x55   : > { %s939_s16 = smov %s941_s9  ;;  %20 = sbr.rel (!%p18_p6) target bundleno = 10 (0xa), region = 92 }
  0x5a   :  { %347 = vsyncpa [#allocation3], 1 }
  0x5b   :  { %349 = vsyncpa [#allocation3 + $0x1], 1 }
  0x5c   :  { %350 = vsyncpa [#allocation4], 1 }
  0x5d   :  { %352 = vsyncpa [#allocation4 + $0x1], 1 }
  0x5e   :  { %353 = vsyncpa [#allocation5], 1 }
  0x5f   :  { %355 = vsyncpa [#allocation5 + $0x1], 1 }
  0x60   :  { %356 = vsyncpa [#allocation6], 1 }
  0x61   :  { %358 = vsyncpa [#allocation6 + $0x1], 1 }

</bundles_post_ra>
